<compile_context>
chip_gen: v5e
topology: v5e:2x2
jax: 0.10.0
libtpu: 0.0.40
codegen_flags: <defaults>
</compile_context>

<pallas_src>
import functools

import jax
import jax.numpy as jnp
import numpy as np
from jax.experimental import pallas as pl
from jax.experimental.pallas import tpu as pltpu

NEG_INF = -1e30


# --------------------------- Stage 1: per-relation projection --------------------------
def _project_kernel(feat_ref, w_ref, wh_ref):
    # bf16 x bf16 -> f32 accumulation on the MXU, stored back as bf16.
    wh_ref[0] = jnp.dot(feat_ref[...], w_ref[0],
                        preferred_element_type=jnp.float32).astype(jnp.bfloat16)


# --------------------- Stage 2: tiled GAT (online softmax over neighbors) --------------
def _gat_kernel(whq_ref, whk_ref, al_ref, ar_ref, b_ref, adj_ref,
                w1_ref, b1_ref, w2_ref, z_ref, s_ref,
                m_sc, l_sc, acc_sc, er_sc):
    k = pl.program_id(2)
    nk = pl.num_programs(2)

    @pl.when(k == 0)
    def _():
        m_sc[...] = jnp.full(m_sc.shape, NEG_INF, m_sc.dtype)
        l_sc[...] = jnp.zeros(l_sc.shape, l_sc.dtype)
        acc_sc[...] = jnp.zeros(acc_sc.shape, acc_sc.dtype)
        # a_r . Wh_i for the query rows -- constant across k, so compute once per q tile.
        er_sc[...] = jnp.sum(whq_ref[0].astype(jnp.float32) * ar_ref[0],
                             axis=-1, keepdims=True)                     # (tq, 1)

    wh_k = whk_ref[0]                                                    # (tk, D) bf16
    wh_k_f32 = wh_k.astype(jnp.float32)
    mask = adj_ref[0] != 0                                               # (tq, tk) bool

    # e[i, j] = leaky_relu(a_r.Wh_i + a_l.Wh_j): tiny matvec for the (1, tk) row, then a
    # plain VPU broadcast-add (no rank-1 N x N MXU op).
    el = jax.lax.dot_general(al_ref[0], wh_k_f32, (((1,), (1,)), ((), ())),
                             preferred_element_type=jnp.float32)         # (1, tk)
    e = er_sc[...] + el                                                  # (tq, tk)
    e = jnp.where(e > 0, e, 0.2 * e)                                     # LeakyReLU(0.2)
    e = jnp.where(mask, e, NEG_INF)

    # Online softmax update (f32).
    m_prev = m_sc[...]
    m_new = jnp.maximum(m_prev, jnp.max(e, axis=-1, keepdims=True))      # (tq, 1)
    corr = jnp.exp(m_prev - m_new)
    p = jnp.where(mask, jnp.exp(e - m_new), 0.0)                         # re-mask: handles
    l_sc[...] = corr * l_sc[...] + jnp.sum(p, axis=-1, keepdims=True)    # zero-degree rows
    acc_sc[...] = corr * acc_sc[...] + jnp.dot(
        p.astype(jnp.bfloat16), wh_k, preferred_element_type=jnp.float32)
    m_sc[...] = m_new

    @pl.when(k == nk - 1)
    def _():
        l = l_sc[...]
        safe_l = jnp.where(l > 0.0, l, 1.0)
        rst = jnp.where(l > 0.0, acc_sc[...] / safe_l, 0.0) + b_ref[0]   # bias (1, D)
        z = jnp.where(rst > 0.0, rst, jnp.exp(jnp.minimum(rst, 0.0)) - 1.0)   # ELU
        z_ref[0] = z
        # Fused semantic-attention per-node score: tanh(z @ W1 + b1) . w2  -> (tq, 1)
        h = jnp.tanh(jnp.dot(z, w1_ref[...], preferred_element_type=jnp.float32)
                     + b1_ref[...])
        s_ref[0] = jnp.sum(h * w2_ref[...], axis=-1, keepdims=True)


# -------------------- Stage 3: semantic attention combine (tiled over N) ---------------
def _combine_kernel(s_ref, z_ref, out_ref, *, inv_n):
    s = jnp.sum(s_ref[...], axis=1) * inv_n        # (R, 1) per-relation mean score
    m = jnp.max(s, axis=0, keepdims=True)          # (1, 1)
    ex = jnp.exp(s - m)                            # (R, 1)
    den = jnp.sum(ex, axis=0, keepdims=True)       # (1, 1)
    acc = jnp.zeros(out_ref.shape, jnp.float32)
    for r in range(z_ref.shape[0]):                # static unroll, R is small
        beta_r = ex[r:r + 1, :] / den              # (1, 1)
        acc = acc + z_ref[r] * beta_r
    out_ref[...] = acc


# ----------------------------------------- wrapper -------------------------------------
def _pick_tile(n, pref=128):
    return pref if n % pref == 0 else n


def han_forward(feat, adj, params, *, tile=128):
    N, F = feat.shape
    R = adj.shape[0]
    D = params["W"].shape[-1]
    A = params["W1"].shape[-1]
    tq = _pick_tile(N, tile)
    tk = _pick_tile(N, tile)
    nq, nk = N // tq, N // tk

    feat_b = feat.astype(jnp.bfloat16)
    w_b = params["W"].astype(jnp.bfloat16)
    adj_i8 = adj if adj.dtype == jnp.int8 else (adj != 0).astype(jnp.int8)

    # ---- Stage 1: Wh[r] = feat @ W_r ----
    wh = pl.pallas_call(
        _project_kernel,
        out_shape=jax.ShapeDtypeStruct((R, N, D), jnp.bfloat16),
        grid=(R, nq),
        in_specs=[
            pl.BlockSpec((tq, F), lambda r, q: (q, 0)),
            pl.BlockSpec((1, F, D), lambda r, q: (r, 0, 0)),
        ],
        out_specs=pl.BlockSpec((1, tq, D), lambda r, q: (r, q, 0)),
        compiler_params=pltpu.CompilerParams(
            dimension_semantics=("parallel", "parallel")),
    )(feat_b, w_b)

    # ---- Stage 2: tiled GAT + fused semantic scores ----
    cost = pl.CostEstimate(
        flops=2 * R * N * N * D + 2 * R * N * D * (A + 2),
        transcendentals=R * N * N + R * N * (A + 2),
        bytes_accessed=R * N * N + (nq + 1) * R * N * D * 2 + R * N * (D + 1) * 4,
    )
    z, s_node = pl.pallas_call(
        _gat_kernel,
        out_shape=(jax.ShapeDtypeStruct((R, N, D), jnp.float32),
                   jax.ShapeDtypeStruct((R, N, 1), jnp.float32)),
        grid=(R, nq, nk),
        in_specs=[
            pl.BlockSpec((1, tq, D), lambda r, q, k: (r, q, 0)),    # Wh, query rows
            pl.BlockSpec((1, tk, D), lambda r, q, k: (r, k, 0)),    # Wh, neighbor rows
            pl.BlockSpec((1, 1, D), lambda r, q, k: (r, 0, 0)),     # attn_l
            pl.BlockSpec((1, 1, D), lambda r, q, k: (r, 0, 0)),     # attn_r
            pl.BlockSpec((1, 1, D), lambda r, q, k: (r, 0, 0)),     # bias
            pl.BlockSpec((1, tq, tk), lambda r, q, k: (r, q, k)),   # int8 adjacency tile
            pl.BlockSpec((D, A), lambda r, q, k: (0, 0)),           # W1
            pl.BlockSpec((1, A), lambda r, q, k: (0, 0)),           # b1
            pl.BlockSpec((1, A), lambda r, q, k: (0, 0)),           # w2
        ],
        out_specs=(pl.BlockSpec((1, tq, D), lambda r, q, k: (r, q, 0)),
                   pl.BlockSpec((1, tq, 1), lambda r, q, k: (r, q, 0))),
        scratch_shapes=[pltpu.VMEM((tq, 1), jnp.float32),    # running max
                        pltpu.VMEM((tq, 1), jnp.float32),    # running denominator
                        pltpu.VMEM((tq, D), jnp.float32),    # running numerator
                        pltpu.VMEM((tq, 1), jnp.float32)],   # er (a_r . Wh_i)
        compiler_params=pltpu.CompilerParams(
            dimension_semantics=("parallel", "parallel", "arbitrary"),
            vmem_limit_bytes=32 * 1024 * 1024),
        cost_estimate=cost,
    )(wh, wh, params["attn_l"], params["attn_r"], params["bias"],
      adj_i8, params["W1"], params["b1"], params["w2"])

    # ---- Stage 3: beta = softmax_r(mean score); out = sum_r beta_r * z_r ----
    out = pl.pallas_call(
        functools.partial(_combine_kernel, inv_n=float(1.0 / N)),
        out_shape=jax.ShapeDtypeStruct((N, D), jnp.float32),
        grid=(nq,),
        in_specs=[
            pl.BlockSpec((R, N, 1), lambda i: (0, 0, 0)),   # per-node scores (tiny)
            pl.BlockSpec((R, tq, D), lambda i: (0, i, 0)),  # z tile, lane-dense D
        ],
        out_specs=pl.BlockSpec((tq, D), lambda i: (i, 0)),
        compiler_params=pltpu.CompilerParams(
            dimension_semantics=("parallel",)),
    )(s_node, z)
    return out


# ------------------------------- pure-JAX reference ------------------------------------
def han_reference(feat, adj, params):
    """Reference HAN forward; mirrors the kernel's bf16 MXU input precision."""
    R = adj.shape[0]
    feat_b = feat.astype(jnp.bfloat16)
    zs, scores = [], []
    for r in range(R):
        wh = jnp.dot(feat_b, params["W"][r].astype(jnp.bfloat16),
                     preferred_element_type=jnp.float32).astype(jnp.bfloat16)
        whf = wh.astype(jnp.float32)
        el = jnp.sum(whf * params["attn_l"][r], axis=-1)     # (N,)
        er = jnp.sum(whf * params["attn_r"][r], axis=-1)     # (N,)
        e = er[:, None] + el[None, :]
        e = jnp.where(e > 0, e, 0.2 * e)
        mask = adj[r] != 0
        e = jnp.where(mask, e, NEG_INF)
        m = jnp.max(e, axis=-1, keepdims=True)
        p = jnp.where(mask, jnp.exp(e - m), 0.0)
        den = jnp.sum(p, axis=-1, keepdims=True)
        num = jnp.dot(p.astype(jnp.bfloat16), wh, preferred_element_type=jnp.float32)
        rst = jnp.where(den > 0, num / jnp.where(den > 0, den, 1.0), 0.0)
        rst = rst + params["bias"][r, 0]
        z_r = jax.nn.elu(rst)
        zs.append(z_r)
        h = jnp.tanh(z_r @ params["W1"] + params["b1"])
        scores.append(jnp.mean(jnp.sum(h * params["w2"], axis=-1)))
    z = jnp.stack(zs, 0)
    beta = jax.nn.softmax(jnp.stack(scores))
    return jnp.einsum("r,rnd->nd", beta, z)


if __name__ == "__main__":
    # Small HAN problem:  HAN(relations, feat_dim=64, embed_dim=128, dim_a=16).
    # embed_dim is a multiple of 128 so all vector stores are lane-dense.
    N, FEAT, EMBED, DIM_A = 256, 64, 128, 16
    relations = ["cites", "writes", "likes"]
    R = len(relations)

    key = jax.random.PRNGKey(0)
    kf, ka, kw, kl, kr, kb, k1, k1b, k2 = jax.random.split(key, 9)

    feat = jax.random.normal(kf, (N, FEAT), jnp.float32)
    adj = jax.random.bernoulli(ka, 0.15, (R, N, N)).astype(jnp.int8)
    adj = adj.at[:, 0, :].set(0)  # node 0 has zero in-degree (allow_zero_in_degree=True)

    params = {
        # GATConv per relation: fc weight, attn_l, attn_r, bias
        "W": 0.1 * jax.random.normal(kw, (R, FEAT, EMBED), jnp.float32),
        "attn_l": 0.1 * jax.random.normal(kl, (R, 1, EMBED), jnp.float32),
        "attn_r": 0.1 * jax.random.normal(kr, (R, 1, EMBED), jnp.float32),
        "bias": 0.1 * jax.random.normal(kb, (R, 1, EMBED), jnp.float32),
        # HanSemanticAttention: Linear(D, A) + Tanh + Linear(A, 1, bias=False)
        "W1": 0.1 * jax.random.normal(k1, (EMBED, DIM_A), jnp.float32),
        "b1": 0.1 * jax.random.normal(k1b, (1, DIM_A), jnp.float32),
        "w2": 0.1 * jax.random.normal(k2, (1, DIM_A), jnp.float32),
    }
    # TODO(synk): layer_norm / readout_fn (pooling) are constructed in HAN.__init__ but
    # never used in HAN.forward, so they are intentionally not implemented here.

    out = jax.block_until_ready(han_forward(feat, adj, params))
    ref = jax.block_until_ready(han_reference(feat, adj, params))

    # bf16 MXU inputs + blocked online-softmax accumulation differ from the one-shot
    # reference at the ~1e-3 level; 1e-2 tolerance is ample.
    np.testing.assert_allclose(np.asarray(out), np.asarray(ref), rtol=1e-2, atol=1e-2)

    print("KERNEL_OK")
</pallas_src>

<mosaic_0001>
module attributes {stable_mosaic.version = 11 : i64} {
  func.func @_project_kernel(%arg0: i32, %arg1: i32, %arg2: memref<128x64xbf16, #tpu.memory_space<vmem>>, %arg3: memref<1x64x128xbf16, #tpu.memory_space<vmem>>, %arg4: memref<1x128x128xbf16, #tpu.memory_space<vmem>>) attributes {dimension_semantics = [#tpu.dimension_semantics<parallel>, #tpu.dimension_semantics<parallel>], iteration_bounds = array<i64: 3, 2>, scalar_prefetch = 0 : i64, scratch_operands = 0 : i64, tpu.core_type = #tpu.core_type<tc>, window_params = [{transform_indices = @transform_0, window_bounds = array<i64: 128, 64>}, {transform_indices = @transform_1, window_bounds = array<i64: 1, 64, 128>}, {transform_indices = @transform_2, window_bounds = array<i64: 1, 128, 128>}]} {
    %c0 = arith.constant 0 : index
    %c0_0 = arith.constant 0 : index
    %0 = vector.load %arg2[%c0, %c0_0] : memref<128x64xbf16, #tpu.memory_space<vmem>>, vector<128x64xbf16>
    %c0_1 = arith.constant 0 : index
    %c0_2 = arith.constant 0 : index
    %c0_3 = arith.constant 0 : index
    %1 = vector.load %arg3[%c0_1, %c0_2, %c0_3] : memref<1x64x128xbf16, #tpu.memory_space<vmem>>, vector<1x64x128xbf16>
    %2 = vector.shape_cast %1 : vector<1x64x128xbf16> to vector<64x128xbf16>
    %cst = arith.constant dense<0.000000e+00> : vector<128x128xf32>
    %3 = tpu.matmul %0, %2, %cst {dimension_numbers = #tpu.dot_dimension_numbers<[1], [0], [0], [1], [0, 0, 1, 1], [], []>} : vector<128x64xbf16>, vector<64x128xbf16>, vector<128x128xf32> -> vector<128x128xf32>
    %4 = arith.truncf %3 : vector<128x128xf32> to vector<128x128xbf16>
    %c0_4 = arith.constant 0 : index
    %c0_5 = arith.constant 0 : index
    %c0_6 = arith.constant 0 : index
    %5 = vector.load %arg4[%c0_4, %c0_5, %c0_6] : memref<1x128x128xbf16, #tpu.memory_space<vmem>>, vector<1x128x128xbf16>
    %6 = vector.shape_cast %5 : vector<1x128x128xbf16> to vector<128x128xbf16>
    %7 = vector.shape_cast %4 : vector<128x128xbf16> to vector<1x128x128xbf16>
    tpu.vector_store %arg4[%c0_4, %c0_5, %c0_6], %7 {strides = array<i32>} : memref<1x128x128xbf16, #tpu.memory_space<vmem>>, vector<1x128x128xbf16>,
    return
  }
  func.func @transform_0(%arg0: i32, %arg1: i32) -> (i32, i32) {
    %c0_i32 = arith.constant 0 : i32
    %c0_i32_0 = arith.constant 0 : i32
    return %arg1, %c0_i32 : i32, i32
  }
  func.func @transform_1(%arg0: i32, %arg1: i32) -> (i32, i32, i32) {
    %c0_i32 = arith.constant 0 : i32
    %c0_i32_0 = arith.constant 0 : i32
    %c0_i32_1 = arith.constant 0 : i32
    return %arg0, %c0_i32, %c0_i32_0 : i32, i32, i32
  }
  func.func @transform_2(%arg0: i32, %arg1: i32) -> (i32, i32, i32) {
    %c0_i32 = arith.constant 0 : i32
    %c0_i32_0 = arith.constant 0 : i32
    return %arg0, %arg1, %c0_i32 : i32, i32, i32
  }
}

</mosaic_0001>

<bundles_post_ra>
// kernel: tpu_custom_call.1
= control target key start
LH: loop header
LB: loop body
LE: loop exit
PB: predicated region body
PF: predicated region fallthrough
CT: control target
= control target key end

     0   :  { %7 = vsyncpa [#allocation3], 0  ;;  %s961_s0 = inlined_call_operand.vmem [shape: bf16[256,64], index: 0, kind: input, shape index: {}]   ;;  %s962_s1 = inlined_call_operand.vmem [shape: bf16[3,64,128], index: 1, kind: input, shape index: {}]   ;;  %s963_s2 = inlined_call_operand.hbm [shape: bf16[3,256,128], index: 2, kind: output, shape index: {}]  }
   0x1   :  { %9 = vsyncpa [#allocation3 + $0x1], 0  ;;  %s810_s9 = smov 0   ;;  %s812_s10 = smov 0  }
   0x2   :  { %s814_s11 = smov 0   ;;  %s816_s12 = smov 0  }
   0x3   :  { %s818_s13 = smov 0   ;;  %s820_s14 = smov 0  }
   0x4   :  { %s822_s15 = smov 0   ;;  %s824_s16 = smov 0  }
   0x5 LB: > { %s480_s17 = sadd.s32 4294967295, %s791_s16   ;;  %s481_s18 = sadd.s32 4294967294, %s791_s16   ;;  %s791_s16 = sphi %s824_s16, %s15_s16   ;;  %s787_s15 = sphi %s822_s15, %s972_s15   ;;  %s783_s14 = sphi %s820_s14, %s971_s14   ;;  %s779_s13 = sphi %s818_s13, %s970_s13   ;;  %s775_s12 = sphi %s816_s12, %s969_s12   ;;  %s771_s11 = sphi %s814_s11, %s968_s11   ;;  %s767_s10 = sphi %s812_s10, %s967_s10   ;;  %s763_s9 = sphi %s810_s9, %s966_s9  }
   0x6   : > { %s24_s19 = sadd.s32 1, %s783_s14  ;;  %s27_s20 = sadd.s32 1, %s787_s15 }
   0x7   : > { %p25_p0 = scmp.ge.s32.totalorder %s24_s19, 2  ;;  %p98_p1 = scmp.ne.s32.totalorder %s771_s11, %s767_s10 }
   0x8   : > { %p99_p2 = scmp.eq.s32.totalorder %s480_s17, 5  ;;  %p104_p5 = scmp.ne.s32.totalorder %s767_s10, %s763_s9 }
   0x9   : > { %s974_s19 = smov (%p25_p0, %s24_s19), 0  ;;  %s976_s20 = smov (!%p25_p0, %s27_s20), %s787_s15 }
   0xa   : > { %s84_s21 = ssub.s32 %s783_s14, %s974_s19  ;;  %p861_p3 = por %p99_p2, %p98_p1 }
   0xb   : > { %p29_p4 = scmp.ge.s32.totalorder %s976_s20, 3  ;;  %p105_p6 = scmp.eq.s32.totalorder %s481_s18, 5 }
   0xc   : > { %p484_p7 = scmp.ge.s32.totalorder %s791_s16, 1  ;;  %p140_p9 = scmp.lt.s32.totalorder %s791_s16, 7 }
   0xd   : > { %s978_s20 = smov (%p29_p4, %s976_s20), 0  ;;  %p870_p8 = por %p105_p6, %p104_p5 }
   0xe   : > { %s83_s24 = ssub.s32 %s787_s15, %s978_s20  ;;  %s88_s25 = sadd.s32 1, %s771_s11 }
   0xf   : > { %s85_s26 = sor.u32 %s84_s21, %s83_s24  ;;  %p141_p10 = pnand %p484_p7, %p140_p9 }
  0x10   : > { %p86_p11 = scmp.eq.s32.totalorder %s85_s26, 0  ;;  %p173_p12 = scmp.lt.s32.totalorder (!%p141_p10), %s779_s13, 2 }
  0x11   : > { %144 = sbr.rel (%p141_p10) target bundleno = 206 (0xce), region = 28  ;;  %s883_s28 = sshll.u32 (!%p141_p10), %s775_s12, 4 }
  0x12   : > { %s879_s27 = scalar_select %p86_p11, %s771_s11, %s88_s25  }
  0x13   : > { %p168_p13 = scmp.lt.s32.totalorder (!%p141_p10), %s883_s28, 31  ;;  %s164_s18 = sand.u32 (!%p141_p10), 1, %s767_s10  }
  0x14   : > { %s485_s21 = sshll.u32 (!%p141_p10), %s164_s18, 6  ;;  %s548_s25 = sshll.u32 (!%p141_p10), %s779_s13, 5 }
  0x15   : > { %s905_s24 = scalar_lea.vmem (!%p141_p10), [#allocation2], %s485_s21  ;;  %s386_s26 = sadd.s32 (!%p141_p10), %s548_s25, %s883_s28 }
  0x16   : > { %s174_s29 = scalar_select %p173_p12, %s779_s13, 2  ;;  %vm268_vm0 = vcmask 523264  }
  0x17   : > { %s169_s6 = scalar_select %p168_p13, %s883_s28, 31 }
  0x18   : > { %s552_s30 = sshll.u32 %s174_s29, 5  ;;  %s549_s29 = sshll.u32 %s386_s26, 2 }
  0x19   : > { %s177_s5 = scalar_lea.vmem %s962_s1, %s552_s30  ;;  %s487_s7 = sshll.u32 %s169_s6, 2 }
  0x1a   : > { %v564_v0 = vld [vmem:[%s177_s5 + $0x18] sm:$0xff]  ;;  %v563_v1 = vld [vmem:[%s177_s5 + $0x10] sm:$0xff]  ;;  %v562_v2 = vld [vmem:[%s177_s5 + $0x8] sm:$0xff]  ;;  %s171_s17 = scalar_lea.vmem %s961_s0, %s487_s7  ;;  %s388_s4 = scalar_lea.hbm %s963_s2, %s549_s29 }
  0x1b   : > { %297 = vmatpush.bf16.msra.mxu0 %v564_v0  ;;  %612 = vmatpush.bf16.msra.mxu1 %v564_v0  ;;  %v561_v3 = vld [vmem:[%s177_s5] sm:$0xff]  ;;  %v555_v5 = vld [vmem:[%s171_s17 + $0x10] sm:$0xff]  ;;  %v554_v8 = vld [vmem:[%s171_s17 + $0x8] sm:$0xff]  ;;  %s389_s13 = sshll.u32 %s905_s24, 4  ;;  %s391_s5 = sshll.u32 %s388_s4, 4  ;;  %s390_s13 = int_to_ptr.vmem [resolvable:$true] %s389_s13  ;;  %s392_s5 = int_to_ptr.hbm [resolvable:$true] %s391_s5 }
  0x1c   : > { %613 = vmatpush.bf16.msra.mxu2 %v564_v0  ;;  %614 = vmatpush.bf16.msra.mxu3 %v564_v0  ;;  %v553_v4 = vld [vmem:[%s171_s17] sm:$0xff]  ;;  %v559_v7 = vld [vmem:[%s171_s17 + $0x30] sm:$0xff]  ;;  %v556_v9 = vld [vmem:[%s171_s17 + $0x18] sm:$0xff]  ;;  %s375_s28 = scalar_lea.sflag [#allocation3], %s164_s18  ;;  %s711_s6 = sshra.s32 %s392_s5, 4  ;;  %s712_s6 = int_to_ptr.hbm [resolvable:$true] %s711_s6 }
  0x1d   : > { %v557_v6 = vld [vmem:[%s171_s17 + $0x20] sm:$0xff]  ;;  %v558_v10 = vld [vmem:[%s171_s17 + $0x28] sm:$0xff]  ;;  %v560_v11 = vld [vmem:[%s171_s17 + $0x38] sm:$0xff]  ;;  %s713_s7 = scalar_lea.hbm %s712_s6, 64  ;;  %s717_s17 = scalar_lea.hbm %s963_s2, 384 }
  0x1e   : > { %p714_p0 = scmp.ne.s32.totalorder %s712_s6, %s713_s7  ;;  %p718_p4 = scmp.lt.s32.totalorder %s712_s6, %s963_s2 }
  0x1f   : > { %298 = vmatpush.bf16.msra.mxu0 %v563_v1  ;;  %615 = vmatpush.bf16.msra.mxu1 %v563_v1  ;;  %p719_p5 = scmp.lt.s32.totalorder %s717_s17, %s713_s7 }
  0x20   : > { %616 = vmatpush.bf16.msra.mxu2 %v563_v1  ;;  %617 = vmatpush.bf16.msra.mxu3 %v563_v1  ;;  %p715_p1 = pnand %p714_p0, %p861_p3 }
  0x21   : > { %p720_p6 = por %p719_p5, %p718_p4 }
  0x22   : > { %p716_p2 = pneg %p715_p1 }
  0x23   : > { %299 = vmatpush.bf16.msra.mxu0 %v562_v2  ;;  %618 = vmatpush.bf16.msra.mxu1 %v562_v2 }
  0x24   : > { %619 = vmatpush.bf16.msra.mxu2 %v562_v2  ;;  %620 = vmatpush.bf16.msra.mxu3 %v562_v2  ;;  %p721_p7 = pnand %p720_p6, %p716_p2 }
  0x27   : > { %300 = vmatpush.bf16.msra.mxu0 %v561_v3  ;;  %621 = vmatpush.bf16.msra.mxu1 %v561_v3 }
  0x28   : > { %622 = vmatpush.bf16.msra.mxu2 %v561_v3  ;;  %623 = vmatpush.bf16.msra.mxu3 %v561_v3 }
  0x2a   : > { %538 = vmatmul.msk.bf16.vlgmr.msra.gmra.mxu0 %vm268_vm0, %v553_v4  ;;  %540 = vmatmul.msk.bf16.vlgmr.msra.gmra.mxu1 %vm268_vm0, %v555_v5 }
  0x2b   : > { %542 = vmatmul.msk.bf16.vlgmr.msra.gmra.mxu2 %vm268_vm0, %v557_v6  ;;  %544 = vmatmul.msk.bf16.vlgmr.msra.gmra.mxu3 %vm268_vm0, %v559_v7 }
  0x3a   : > { %539 = vmatmul.msk.bf16.gmra.mxu0 %vm268_vm0, %v554_v8  ;;  %541 = vmatmul.msk.bf16.gmra.mxu1 %vm268_vm0, %v556_v9 }
  0x3b   : > { %543 = vmatmul.msk.bf16.gmra.mxu2 %vm268_vm0, %v558_v10  ;;  %545 = vmatmul.msk.bf16.gmra.mxu3 %vm268_vm0, %v560_v11 }
  0xa7   : > { %v302_v12 = vpop.f32.mrf.mxu0  ;;  %v312_v13 = vpop.f32.mrf.mxu1 }
  0xae   : > { %v322_v14 = vpop.f32.mrf.mxu2  ;;  %v332_v15 = vpop.f32.mrf.mxu3 }
  0xaf   : > { %v304_v16 = vpop.f32.mrf.mxu0  ;;  %v314_v17 = vpop.f32.mrf.mxu1 }
  0xb0   : > { %v568_v18 = vpack.c.bf16 %v304_v16, %v302_v12  ;;  %v578_v19 = vpack.c.bf16 %v314_v17, %v312_v13 }
  0xb2   : > { %569 = vst [vmem:[%s905_s24] sm:$0xff] %v568_v18  }
  0xb3   : > { %606 = vst [vmem:[%s905_s24 + $0x10] sm:$0xff] %v578_v19  }
  0xb6   : > { %v324_v20 = vpop.f32.mrf.mxu2  ;;  %v334_v21 = vpop.f32.mrf.mxu3 }
  0xb7   : > { %v588_v22 = vpack.c.bf16 %v324_v20, %v322_v14  ;;  %v598_v23 = vpack.c.bf16 %v334_v21, %v332_v15  ;;  %v307_v24 = vpop.f32.mrf.mxu0  ;;  %v317_v25 = vpop.f32.mrf.mxu1 }
  0xb9   : > { %608 = vst [vmem:[%s905_s24 + $0x20] sm:$0xff] %v588_v22  }
  0xba   : > { %610 = vst [vmem:[%s905_s24 + $0x30] sm:$0xff] %v598_v23  }
  0xbe   : > { %v327_v26 = vpop.f32.mrf.mxu2  ;;  %v337_v27 = vpop.f32.mrf.mxu3 }
  0xbf   : > { %v309_v28 = vpop.f32.mrf.mxu0  ;;  %v319_v29 = vpop.f32.mrf.mxu1 }
  0xc0   : > { %v573_v30 = vpack.c.bf16 %v309_v28, %v307_v24  ;;  %v583_v31 = vpack.c.bf16 %v319_v29, %v317_v25 }
  0xc2   : > { %605 = vst [vmem:[%s905_s24 + $0x8] sm:$0xff] %v573_v30  }
  0xc3   : > { %607 = vst [vmem:[%s905_s24 + $0x18] sm:$0xff] %v583_v31  }
  0xc6   : > { %v329_v32 = vpop.f32.mrf.mxu2  ;;  %v339_v33 = vpop.f32.mrf.mxu3 }
  0xc7   : > { %v593_v34 = vpack.c.bf16 %v329_v32, %v327_v26  ;;  %v603_v35 = vpack.c.bf16 %v339_v33, %v337_v27 }
  0xc9   : > { %609 = vst [vmem:[%s905_s24 + $0x28] sm:$0xff] %v593_v34  }
  0xca   : > { %611 = vst [vmem:[%s905_s24 + $0x38] sm:$0xff] %v603_v35  }
  0xcb   : > { %724 = shalt.err (!%p721_p7)
}
  0xcc   : > { %s793_s18 = smov 64   ;;  %s794_s24 = smov 4  }
  0xcd   : > { %624 = dma.vmem_to_hbm [thread:$0]  (%p861_p3), %s390_s13, 1024, %s392_s5, %s375_s28, %s793_s18, %s793_s18, %s794_s24  }
  0xce PF: > { %p630_p9 = scmp.ge.s32.totalorder %s791_s16, 2  ;;  %s406_s26 = sand.u32 1, %s763_s9  }
  0xcf   : > { %s407_s29 = scalar_lea.sflag [#allocation3], %s406_s26 }
  0xd0   : > { %p627_p10 = pnand %p630_p9, %p870_p8 }
  0xd2   : > { %p628_p11 = pneg %p627_p10 }
  0xd4   : > { %758 = dma.done.wait (%p628_p11), %s407_s29, 1024  }
  0xd5   : > { %760 = vsyncadd (%p628_p11), %s407_s29, 4294966272  ;;  %s15_s16 = sadd.s32 1, %s791_s16   ;;  %s966_s9 = smov %s767_s10 }
  0xd6   : > { %p12_p12 = scmp.ge.s32.totalorder %s15_s16, 8   ;;  %s967_s10 = smov %s771_s11 }
  0xd7   : > { %s968_s11 = smov %s879_s27  ;;  %s969_s12 = smov %s783_s14 }
  0xd8   : > { %s970_s13 = smov %s787_s15  ;;  %s971_s14 = smov %s974_s19 }
  0xd9   : > { %s972_s15 = smov %s978_s20  ;;  %14 = sbr.rel (!%p12_p12) target bundleno = 5 (0x5), region = 66 }
  0xde   :  { %413 = vsyncpa [#allocation3], 1 }
  0xdf   :  { %415 = vsyncpa [#allocation3 + $0x1], 1 }

</bundles_post_ra>
